<compile_context>
chip_gen: v7x
topology: tpu7x:2x2x1
jax: 0.10.0
libtpu: 0.0.40
codegen_flags: <defaults>
</compile_context>

<pallas_src>
import jax
import jax.numpy as jnp
from jax.experimental import pallas as pl
from jax.experimental.pallas import tpu as pltpu


def _round_up(x: int, m: int) -> int:
    return (x + m - 1) // m * m


def _make_mlp_kernel(num_inner_layers: int):
    """Fused MLP kernel.

    Inputs (refs, in order):
      x_ref : (TM, hid_p)  pre-activation of the input block WITHOUT bias
              (i.e. one_hot(noised) @ W0, computed as a gather in the wrapper)
      b0, (W1, b1) * num_inner_layers, (Wout, bout)
      out_ref : (TM, out_p)
    """

    def kernel(x_ref, *refs):
        out_ref = refs[-1]
        p = refs[:-1]
        # Input block: bias + ReLU (its matmul was folded into the gather).
        h = jnp.maximum(x_ref[...] + p[0][...], 0.0)
        k = 1
        for _ in range(num_inner_layers):
            w = p[k][...]
            b = p[k + 1][...]
            h = jnp.maximum(
                jnp.dot(h, w, preferred_element_type=jnp.float32) + b, 0.0
            )
            k += 2
        w_out = p[k][...]
        b_out = p[k + 1][...]
        out_ref[...] = (
            jnp.dot(h, w_out, preferred_element_type=jnp.float32) + b_out
        ).astype(out_ref.dtype)

    return kernel


def mlp_forward(noised_ids, params, *, vocab_size: int, block_m: int = 128):
    """Window-MLP forward pass.

    noised_ids: (B, window_size-1) int32 token ids in [0, vocab_size)
    params: [(W0, b0), (W1, b1), ..., (Wout, bout)], W: (in, out), b: (1, out)
    """
    B, w_ctx = noised_ids.shape
    w0, b0 = params[0]
    rest = params[1:]
    hid = w0.shape[1]
    out_dim = rest[-1][0].shape[1]
    inner = rest[:-1]                      # `depth` inner (hid, hid) layers
    w_out, b_out = rest[-1]

    # ---- First layer as a gather: one_hot(ids) @ W0 == sum_j W0[j*V + ids[:, j]] ----
    offsets = jnp.arange(w_ctx, dtype=noised_ids.dtype) * vocab_size
    flat_rows = (noised_ids + offsets[None, :]).reshape(-1)
    gathered = jnp.take(w0, flat_rows, axis=0).reshape(B, w_ctx, hid)
    x0 = gathered.sum(axis=1).astype(jnp.float32)          # (B, hid), no bias yet

    # ---- Pad to lane/sublane/MXU-friendly shapes ----
    hid_p = _round_up(hid, 128)
    out_p = _round_up(out_dim, 128)
    tm = block_m if B >= block_m else _round_up(B, 8)
    b_p = _round_up(B, tm)
    nb = pl.cdiv(b_p, tm)

    def pad2(a, r, c):
        return jnp.zeros((r, c), jnp.float32).at[: a.shape[0], : a.shape[1]].set(
            a.astype(jnp.float32)
        )

    x_p = pad2(x0, b_p, hid_p)
    flat_params = [pad2(b0, 1, hid_p)]
    for w, b in inner:
        flat_params += [pad2(w, hid_p, hid_p), pad2(b, 1, hid_p)]
    flat_params += [pad2(w_out, hid_p, out_p), pad2(b_out, 1, out_p)]

    # ---- Block specs: batch-tiled activations, VMEM-resident weights ----
    x_spec = pl.BlockSpec((tm, hid_p), lambda i: (i, 0))

    def resident(shape):
        return pl.BlockSpec(shape, lambda i: (0, 0))

    in_specs = [x_spec, resident((1, hid_p))]
    for _ in range(len(inner)):
        in_specs += [resident((hid_p, hid_p)), resident((1, hid_p))]
    in_specs += [resident((hid_p, out_p)), resident((1, out_p))]
    out_spec = pl.BlockSpec((tm, out_p), lambda i: (i, 0))

    # ---- Cost / VMEM budgeting (f32) ----
    n_inner = len(inner)
    flops = 2 * b_p * (n_inner * hid_p * hid_p + hid_p * out_p)
    weight_bytes = 4 * (
        n_inner * hid_p * hid_p + hid_p * out_p + (n_inner + 1) * hid_p + out_p
    )
    bytes_accessed = weight_bytes + 4 * b_p * (hid_p + out_p)
    # resident weights + double-buffered x/out tiles + slack; capped for v7x (64 MiB/TC)
    vmem_needed = weight_bytes + 2 * 4 * tm * (hid_p + out_p) + (2 << 20)
    vmem_limit = int(min(max(vmem_needed, 16 << 20), 64 << 20))

    out = pl.pallas_call(
        _make_mlp_kernel(n_inner),
        out_shape=jax.ShapeDtypeStruct((b_p, out_p), jnp.float32),
        grid=(nb,),
        in_specs=in_specs,
        out_specs=out_spec,
        compiler_params=pltpu.CompilerParams(
            dimension_semantics=("parallel",),
            vmem_limit_bytes=vmem_limit,
        ),
        cost_estimate=pl.CostEstimate(
            flops=flops, transcendentals=0, bytes_accessed=bytes_accessed
        ),
    )(x_p, *flat_params)

    return out[:B, :out_dim]


def init_params(key, window_size: int, vocab_size: int, hid_size: int, depth: int):
    """Deterministic synthetic parameters, shapes match the PyTorch module."""
    in_dim = (window_size - 1) * vocab_size
    dims = [in_dim] + [hid_size] * (1 + depth) + [vocab_size]
    params = []
    for i in range(len(dims) - 1):
        key, kw, kb = jax.random.split(key, 3)
        fan_in = dims[i]
        w = jax.random.normal(kw, (dims[i], dims[i + 1]), jnp.float32) * (
            1.0 / jnp.sqrt(fan_in)
        )
        b = jax.random.normal(kb, (1, dims[i + 1]), jnp.float32) * 0.01
        params.append((w, b))
    return params


def _reference(noised_ids, params, vocab_size):
    """Pure-JAX reference with the original one-hot semantics."""
    x = jax.nn.one_hot(noised_ids, vocab_size, dtype=jnp.float32).reshape(
        noised_ids.shape[0], -1
    )
    h = x
    for w, b in params[:-1]:
        h = jnp.maximum(h @ w + b, 0.0)
    w, b = params[-1]
    return h @ w + b


if __name__ == "__main__":
    window_size = 5   # -> (window_size - 1) = 4 context tokens
    vocab_size = 16
    hid_size = 32
    depth = 1
    batch = 8

    key = jax.random.PRNGKey(0)
    key, k_ids = jax.random.split(key)
    noised = jax.random.randint(
        k_ids, (batch, window_size - 1), 0, vocab_size, dtype=jnp.int32
    )

    params = init_params(key, window_size, vocab_size, hid_size, depth)

    out = mlp_forward(noised, params, vocab_size=vocab_size)
    out = jax.block_until_ready(out)

    ref = _reference(noised, params, vocab_size)
    assert out.shape == (batch, vocab_size)
    assert jnp.allclose(out, ref, atol=1e-3, rtol=1e-3), (
        float(jnp.max(jnp.abs(out - ref)))
    )

    print("KERNEL_OK")
</pallas_src>

<mosaic_0001>
module attributes {stable_mosaic.version = 11 : i64} {
  func.func @kernel(%arg0: i32, %arg1: memref<8x128xf32, #tpu.memory_space<vmem>>, %arg2: memref<1x128xf32, #tpu.memory_space<vmem>>, %arg3: memref<128x128xf32, #tpu.memory_space<vmem>>, %arg4: memref<1x128xf32, #tpu.memory_space<vmem>>, %arg5: memref<128x128xf32, #tpu.memory_space<vmem>>, %arg6: memref<1x128xf32, #tpu.memory_space<vmem>>, %arg7: memref<8x128xf32, #tpu.memory_space<vmem>>) attributes {dimension_semantics = [#tpu.dimension_semantics<parallel>], iteration_bounds = array<i64: 1>, scalar_prefetch = 0 : i64, scratch_operands = 0 : i64, tpu.core_type = #tpu.core_type<tc>, window_params = [{transform_indices = @transform_0, window_bounds = array<i64: 8, 128>}, {pipeline_mode = #tpu.pipeline_mode<synchronous>, transform_indices = @transform_1, window_bounds = array<i64: 1, 128>}, {pipeline_mode = #tpu.pipeline_mode<synchronous>, transform_indices = @transform_2, window_bounds = array<i64: 128, 128>}, {pipeline_mode = #tpu.pipeline_mode<synchronous>, transform_indices = @transform_3, window_bounds = array<i64: 1, 128>}, {pipeline_mode = #tpu.pipeline_mode<synchronous>, transform_indices = @transform_4, window_bounds = array<i64: 128, 128>}, {pipeline_mode = #tpu.pipeline_mode<synchronous>, transform_indices = @transform_5, window_bounds = array<i64: 1, 128>}, {transform_indices = @transform_6, window_bounds = array<i64: 8, 128>}]} {
    %c0 = arith.constant 0 : index
    %c0_0 = arith.constant 0 : index
    %0 = vector.load %arg1[%c0, %c0_0] : memref<8x128xf32, #tpu.memory_space<vmem>>, vector<8x128xf32>
    %c0_1 = arith.constant 0 : index
    %c0_2 = arith.constant 0 : index
    %1 = vector.load %arg2[%c0_1, %c0_2] : memref<1x128xf32, #tpu.memory_space<vmem>>, vector<1x128xf32>
    %2 = vector.broadcast %1 : vector<1x128xf32> to vector<8x128xf32>
    %3 = arith.addf %0, %2 : vector<8x128xf32>
    %cst = arith.constant 0.000000e+00 : f32
    %4 = vector.broadcast %cst : f32 to vector<8x128xf32>
    %5 = arith.maximumf %3, %4 : vector<8x128xf32>
    %c0_3 = arith.constant 0 : index
    %c0_4 = arith.constant 0 : index
    %6 = vector.load %arg3[%c0_3, %c0_4] : memref<128x128xf32, #tpu.memory_space<vmem>>, vector<128x128xf32>
    %c0_5 = arith.constant 0 : index
    %c0_6 = arith.constant 0 : index
    %7 = vector.load %arg4[%c0_5, %c0_6] : memref<1x128xf32, #tpu.memory_space<vmem>>, vector<1x128xf32>
    %cst_7 = arith.constant dense<0.000000e+00> : vector<8x128xf32>
    %8 = tpu.matmul %5, %6, %cst_7 {dimension_numbers = #tpu.dot_dimension_numbers<[1], [0], [0], [1], [0, 0, 1, 1], [], []>} : vector<8x128xf32>, vector<128x128xf32>, vector<8x128xf32> -> vector<8x128xf32>
    %9 = vector.broadcast %7 : vector<1x128xf32> to vector<8x128xf32>
    %10 = arith.addf %8, %9 : vector<8x128xf32>
    %cst_8 = arith.constant 0.000000e+00 : f32
    %11 = vector.broadcast %cst_8 : f32 to vector<8x128xf32>
    %12 = arith.maximumf %10, %11 : vector<8x128xf32>
    %c0_9 = arith.constant 0 : index
    %c0_10 = arith.constant 0 : index
    %13 = vector.load %arg5[%c0_9, %c0_10] : memref<128x128xf32, #tpu.memory_space<vmem>>, vector<128x128xf32>
    %c0_11 = arith.constant 0 : index
    %c0_12 = arith.constant 0 : index
    %14 = vector.load %arg6[%c0_11, %c0_12] : memref<1x128xf32, #tpu.memory_space<vmem>>, vector<1x128xf32>
    %cst_13 = arith.constant dense<0.000000e+00> : vector<8x128xf32>
    %15 = tpu.matmul %12, %13, %cst_13 {dimension_numbers = #tpu.dot_dimension_numbers<[1], [0], [0], [1], [0, 0, 1, 1], [], []>} : vector<8x128xf32>, vector<128x128xf32>, vector<8x128xf32> -> vector<8x128xf32>
    %16 = vector.broadcast %14 : vector<1x128xf32> to vector<8x128xf32>
    %17 = arith.addf %15, %16 : vector<8x128xf32>
    %c0_14 = arith.constant 0 : index
    %c0_15 = arith.constant 0 : index
    %18 = vector.load %arg7[%c0_14, %c0_15] : memref<8x128xf32, #tpu.memory_space<vmem>>, vector<8x128xf32>
    tpu.vector_store %arg7[%c0_14, %c0_15], %17 {strides = array<i32>} : memref<8x128xf32, #tpu.memory_space<vmem>>, vector<8x128xf32>,
    return
  }
  func.func @transform_0(%arg0: i32) -> (i32, i32) {
    %c0_i32 = arith.constant 0 : i32
    %c0_i32_0 = arith.constant 0 : i32
    return %arg0, %c0_i32 : i32, i32
  }
  func.func @transform_1(%arg0: i32) -> (i32, i32) {
    %c0_i32 = arith.constant 0 : i32
    %c0_i32_0 = arith.constant 0 : i32
    %c0_i32_1 = arith.constant 0 : i32
    return %c0_i32, %c0_i32_0 : i32, i32
  }
  func.func @transform_2(%arg0: i32) -> (i32, i32) {
    %c0_i32 = arith.constant 0 : i32
    %c0_i32_0 = arith.constant 0 : i32
    %c0_i32_1 = arith.constant 0 : i32
    return %c0_i32, %c0_i32_0 : i32, i32
  }
  func.func @transform_3(%arg0: i32) -> (i32, i32) {
    %c0_i32 = arith.constant 0 : i32
    %c0_i32_0 = arith.constant 0 : i32
    %c0_i32_1 = arith.constant 0 : i32
    return %c0_i32, %c0_i32_0 : i32, i32
  }
  func.func @transform_4(%arg0: i32) -> (i32, i32) {
    %c0_i32 = arith.constant 0 : i32
    %c0_i32_0 = arith.constant 0 : i32
    %c0_i32_1 = arith.constant 0 : i32
    return %c0_i32, %c0_i32_0 : i32, i32
  }
  func.func @transform_5(%arg0: i32) -> (i32, i32) {
    %c0_i32 = arith.constant 0 : i32
    %c0_i32_0 = arith.constant 0 : i32
    %c0_i32_1 = arith.constant 0 : i32
    return %c0_i32, %c0_i32_0 : i32, i32
  }
  func.func @transform_6(%arg0: i32) -> (i32, i32) {
    %c0_i32 = arith.constant 0 : i32
    %c0_i32_0 = arith.constant 0 : i32
    return %arg0, %c0_i32 : i32, i32
  }
}

</mosaic_0001>

<bundles_post_ra>
// kernel: tpu_custom_call.1
= control target key start
LH: loop header
LB: loop body
LE: loop exit
PB: predicated region body
PF: predicated region fallthrough
CT: control target
= control target key end

     0   :  { %11 = vsyncpa [#allocation3], 0  ;;  %s658_s0 = inlined_call_operand.hbm [shape: f32[8,128], index: 0, kind: input, shape index: {}]   ;;  %s659_s1 = inlined_call_operand.vmem [shape: f32[1,128], index: 1, kind: input, shape index: {}]   ;;  %s660_s2 = inlined_call_operand.hbm [shape: f32[128,128], index: 2, kind: input, shape index: {}]   ;;  %s661_s3 = inlined_call_operand.vmem [shape: f32[1,128], index: 3, kind: input, shape index: {}]   ;;  %s662_s4 = inlined_call_operand.hbm [shape: f32[128,128], index: 4, kind: input, shape index: {}]   ;;  %s663_s5 = inlined_call_operand.vmem [shape: f32[1,128], index: 5, kind: input, shape index: {}]   ;;  %s664_s6 = inlined_call_operand.hbm [shape: f32[8,128], index: 6, kind: output, shape index: {}]  }
   0x1   :  { %12 = vsyncpa [#allocation6], 0 }
   0x2   :  { %13 = vsyncpa [#allocation4], 0  ;;  %s535_s21 = smov [#allocation5]   ;;  %s441_s25 = scalar_lea.hbm %s660_s2, 2048 }
   0x3   :  { %s31_s22 = sshll.u32 %s535_s21, 4  ;;  %p442_p0 = scmp.ne.s32.totalorder %s660_s2, %s441_s25  ;;  %s32_s22 = int_to_ptr.vmem [resolvable:$true] %s31_s22 }
   0x4   :  { %p445_p1 = scmp.lt.u32.totalorder %s441_s25, %s660_s2 }
   0x6   :  { %p447_p2 = pnand %p445_p1, %p442_p0 }
   0x8   :  { %450 = shalt.err (!%p447_p2)
}
   0x9   :  { %s451_s30 = scalar_lea.vmem %s32_s22, 2048  ;;  %p456_p4 = scmp.lt.s32.totalorder %s32_s22, %s32_s22 }
   0xa   :  { %p452_p3 = scmp.ne.s32.totalorder %s32_s22, %s451_s30  ;;  %p457_p5 = scmp.lt.s32.totalorder %s451_s30, %s451_s30 }
   0xc   :  { %p458_p6 = por %p457_p5, %p456_p4 }
   0xe   :  { %p459_p7 = pnand %p458_p6, %p452_p3 }
  0x10   :  { %462 = shalt.err (!%p459_p7)
}
  0x11   :  { %s536_s7 = smov 128   ;;  %s537_s8 = smov 8  }
  0x12   :  { %37 = dma.hbm_to_vmem [thread:$0]  %s660_s2, 2048, %s32_s22, [#allocation6], %s536_s7, %s536_s7, %s537_s8  }
  0x13   :  { %s538_s11 = smov [#allocation2]   ;;  %s539_s13 = smov [#allocation7]  }
  0x14   :  { %s20_s12 = sshll.u32 %s538_s11, 4  ;;  %s45_s14 = sshll.u32 %s539_s13, 4  ;;  %s21_s12 = int_to_ptr.vmem [resolvable:$true] %s20_s12  ;;  %s46_s14 = int_to_ptr.vmem [resolvable:$true] %s45_s14 }
  0x15   :  { %s463_s17 = scalar_lea.hbm %s658_s0, 128 }
  0x16   :  { %p464_p8 = scmp.ne.s32.totalorder %s658_s0, %s463_s17  ;;  %p467_p9 = scmp.lt.u32.totalorder %s463_s17, %s658_s0 }
  0x18   :  { %p469_p10 = pnand %p467_p9, %p464_p8 }
  0x1a   :  { %472 = shalt.err (!%p469_p10)
}
  0x1b   :  { %s473_s2 = scalar_lea.vmem %s21_s12, 128  ;;  %p478_p12 = scmp.lt.s32.totalorder %s21_s12, %s21_s12 }
  0x1c   :  { %p474_p11 = scmp.ne.s32.totalorder %s21_s12, %s473_s2  ;;  %p479_p13 = scmp.lt.s32.totalorder %s473_s2, %s473_s2 }
  0x1e   :  { %p480_p0 = por %p479_p13, %p478_p12 }
  0x20   :  { %p481_p1 = pnand %p480_p0, %p474_p11 }
  0x22   :  { %484 = shalt.err (!%p481_p1)
}
  0x23   :  { %23 = dma.hbm_to_vmem [thread:$0]  %s658_s0, 128, %s21_s12, [#allocation3]  }
  0x24   :  { %s485_s26 = scalar_lea.hbm %s662_s4, 2048 }
  0x25   :  { %p486_p2 = scmp.ne.s32.totalorder %s662_s4, %s485_s26  ;;  %p489_p3 = scmp.lt.u32.totalorder %s485_s26, %s662_s4 }
  0x27   :  { %p491_p4 = pnand %p489_p3, %p486_p2 }
  0x29   :  { %494 = shalt.err (!%p491_p4)
}
  0x2a   :  { %s495_s9 = scalar_lea.vmem %s46_s14, 2048  ;;  %p500_p6 = scmp.lt.s32.totalorder %s46_s14, %s46_s14 }
  0x2b   :  { %p496_p5 = scmp.ne.s32.totalorder %s46_s14, %s495_s9  ;;  %p501_p7 = scmp.lt.s32.totalorder %s495_s9, %s495_s9 }
  0x2d   :  { %p502_p8 = por %p501_p7, %p500_p6 }
  0x2f   :  { %p503_p9 = pnand %p502_p8, %p496_p5 }
  0x31   :  { %506 = shalt.err (!%p503_p9)
}
  0x32   :  { %51 = dma.hbm_to_vmem [thread:$0]  %s662_s4, 2048, %s46_s14, [#allocation6], %s536_s7, %s536_s7, %s537_s8  }
  0x33   :  { %529 = dma.done.wait [#allocation3], 128  }
  0x34   :  { %530 = vsyncadd [#allocation3], 4294967168 }
  0x35   :  { %531 = dma.done.wait [#allocation6], 4096  }
  0x36   :  { %532 = vsyncadd [#allocation6], 4294963200  ;;  %v540_v0 = vmov 0.0|0.0   ;;  %vm541_vm0 = vmmov 0   ;;  %v542_v1 = vmov 0.0   ;;  %v73_v2 = vld [vmem:[#allocation5] sm:$0xff] }
  0x37   :  { %384 = vmatprep.subr.bf16.mxu0 %v540_v0  ;;  %346 = vmatprep.mubr.msk.f32.mxu0 %vm541_vm0, %v542_v1  ;;  %v74_v3 = vld [vmem:[#allocation5 + $0x8] sm:$0xff]  ;;  %v75_v4 = vld [vmem:[#allocation5 + $0x10] sm:$0xff]  ;;  %v76_v6 = vld [vmem:[#allocation5 + $0x18] sm:$0xff]  ;;  %s543_s13 = smov [#allocation8]  }
  0x38   :  { %408 = vmatprep.subr.bf16.mxu1 %v540_v0  ;;  %381 = vmatprep.mubr.msk.f32.mxu1 %vm541_vm0, %v542_v1  ;;  %v385_v5 = vpack.c.bf16 %v74_v3, %v73_v2  ;;  %v388_v7 = vpack.c.bf16 %v76_v6, %v75_v4  ;;  %v77_v8 = vld [vmem:[#allocation5 + $0x20] sm:$0xff]  ;;  %v78_v9 = vld [vmem:[#allocation5 + $0x28] sm:$0xff]  ;;  %v169_v12 = vld [vmem:[#allocation7 + $0x10] sm:$0xff]  ;;  %s267_s14 = sshll.u32 %s543_s13, 4  ;;  %s268_s14 = int_to_ptr.vmem [resolvable:$true] %s267_s14 }
  0x39   :  { %v167_v10 = vld [vmem:[#allocation7] sm:$0xff]  ;;  %v168_v11 = vld [vmem:[#allocation7 + $0x8] sm:$0xff]  ;;  %v391_v13 = vpack.c.bf16 %v78_v9, %v77_v8  ;;  %v170_v15 = vld [vmem:[#allocation7 + $0x18] sm:$0xff]  ;;  %s507_s15 = scalar_lea.vmem %s268_s14, 128  ;;  %p512_p11 = scmp.lt.s32.totalorder %s268_s14, %s268_s14 }
  0x3a   :  { %386 = vmatpush3.bf16.msra.mxu0 %v385_v5  ;;  %v409_v14 = vpack.c.bf16 %v168_v11, %v167_v10  ;;  %v79_v16 = vld [vmem:[#allocation5 + $0x30] sm:$0xff]  ;;  %v80_v17 = vld [vmem:[#allocation5 + $0x38] sm:$0xff]  ;;  %v412_v18 = vpack.c.bf16 %v170_v15, %v169_v12  ;;  %v171_v19 = vld [vmem:[#allocation7 + $0x20] sm:$0xff]  ;;  %p508_p10 = scmp.ne.s32.totalorder %s268_s14, %s507_s15  ;;  %p513_p12 = scmp.lt.s32.totalorder %s507_s15, %s507_s15 }
  0x3b   :  { %387 = vmatprep.subr.bf16.mxu0 %v540_v0  ;;  %v172_v20 = vld [vmem:[#allocation7 + $0x28] sm:$0xff]  ;;  %v394_v21 = vpack.c.bf16 %v80_v17, %v79_v16  ;;  %v81_v22 = vld [vmem:[#allocation5 + $0x40] sm:$0xff]  ;;  %v173_v25 = vld [vmem:[#allocation7 + $0x30] sm:$0xff] }
  0x3c   :  { %410 = vmatpush3.bf16.msra.mxu1 %v409_v14  ;;  %v82_v23 = vld [vmem:[#allocation5 + $0x48] sm:$0xff]  ;;  %v415_v24 = vpack.c.bf16 %v172_v20, %v171_v19  ;;  %v174_v26 = vld [vmem:[#allocation7 + $0x38] sm:$0xff]  ;;  %v83_v28 = vld [vmem:[#allocation5 + $0x50] sm:$0xff]  ;;  %p514_p13 = por %p513_p12, %p512_p11 }
  0x3d   :  { %411 = vmatprep.subr.bf16.mxu1 %v540_v0  ;;  %v397_v27 = vpack.c.bf16 %v82_v23, %v81_v22  ;;  %v84_v29 = vld [vmem:[#allocation5 + $0x58] sm:$0xff]  ;;  %v418_v30 = vpack.c.bf16 %v174_v26, %v173_v25  ;;  %v175_v31 = vld [vmem:[#allocation7 + $0x40] sm:$0xff]  ;;  %v176_v32 = vld [vmem:[#allocation7 + $0x48] sm:$0xff] }
  0x3e   :  { %389 = vmatpush3.bf16.msra.mxu0 %v388_v7  ;;  %v400_v33 = vpack.c.bf16 %v84_v29, %v83_v28  ;;  %v85_v34 = vld [vmem:[#allocation5 + $0x60] sm:$0xff]  ;;  %v86_v35 = vld [vmem:[#allocation5 + $0x68] sm:$0xff]  ;;  %v421_v36 = vpack.c.bf16 %v176_v32, %v175_v31  ;;  %v177_v37 = vld [vmem:[#allocation7 + $0x50] sm:$0xff]  ;;  %p515_p0 = pnand %p514_p13, %p508_p10 }
  0x3f   :  { %390 = vmatprep.subr.bf16.mxu0 %v540_v0  ;;  %v178_v38 = vld [vmem:[#allocation7 + $0x58] sm:$0xff]  ;;  %v403_v39 = vpack.c.bf16 %v86_v35, %v85_v34  ;;  %v87_v42 = vld [vmem:[#allocation5 + $0x70] sm:$0xff]  ;;  %v179_v46 = vld [vmem:[#allocation7 + $0x60] sm:$0xff] }
  0x40   :  { %413 = vmatpush3.bf16.msra.mxu1 %v412_v18  ;;  %v63_v40 = vld [vmem:[#allocation2] sm:$0xff]  ;;  %v424_v44 = vpack.c.bf16 %v178_v38, %v177_v37  ;;  %v180_v47 = vld [vmem:[#allocation7 + $0x68] sm:$0xff]  ;;  %v181_v51 = vld [vmem:[#allocation7 + $0x70] sm:$0xff] }
  0x41   :  { %414 = vmatprep.subr.bf16.mxu1 %v540_v0  ;;  %v277_v41 = vld [vmem:[%s659_s1] ss:$0 sm:$0xff]  ;;  %v427_v49 = vpack.c.bf16 %v180_v47, %v179_v46 }
  0x42   :  { %392 = vmatpush3.bf16.msra.mxu0 %v391_v13  ;;  %v88_v43 = vld [vmem:[#allocation5 + $0x78] sm:$0xff]  ;;  %v71_v45 = vadd.f32 %v277_v41, %v63_v40 }
  0x43   :  { %393 = vmatprep.subr.bf16.mxu0 %v540_v0  ;;  %v406_v48 = vpack.c.bf16 %v88_v43, %v87_v42  ;;  %v182_v52 = vld [vmem:[#allocation7 + $0x78] sm:$0xff] }
  0x44   :  { %416 = vmatpush3.bf16.msra.mxu1 %v415_v24  ;;  %v72_v50 = vmax.f32 %v71_v45, 0.0  ;;  %v430_v53 = vpack.c.bf16 %v182_v52, %v181_v51  ;;  %v278_v54 = vld [vmem:[%s661_s3] ss:$0 sm:$0xff] }
  0x45   :  { %417 = vmatprep.subr.bf16.mxu1 %v540_v0  ;;  %v279_v59 = vld [vmem:[%s663_s5] ss:$0 sm:$0xff] }
  0x46   :  { %395 = vmatpush3.bf16.msra.mxu0 %v394_v21 }
  0x47   :  { %396 = vmatprep.subr.bf16.mxu0 %v540_v0 }
  0x48   :  { %419 = vmatpush3.bf16.msra.mxu1 %v418_v30 }
  0x49   :  { %420 = vmatprep.subr.bf16.mxu1 %v540_v0 }
  0x4a   :  { %398 = vmatpush3.bf16.msra.mxu0 %v397_v27 }
  0x4b   :  { %399 = vmatprep.subr.bf16.mxu0 %v540_v0 }
  0x4c   :  { %422 = vmatpush3.bf16.msra.mxu1 %v421_v36 }
  0x4d   :  { %423 = vmatprep.subr.bf16.mxu1 %v540_v0 }
  0x4e   :  { %401 = vmatpush3.bf16.msra.mxu0 %v400_v33 }
  0x4f   :  { %402 = vmatprep.subr.bf16.mxu0 %v540_v0 }
  0x50   :  { %425 = vmatpush3.bf16.msra.mxu1 %v424_v44 }
  0x51   :  { %426 = vmatprep.subr.bf16.mxu1 %v540_v0 }
  0x52   :  { %404 = vmatpush3.bf16.msra.mxu0 %v403_v39 }
  0x53   :  { %405 = vmatprep.subr.bf16.mxu0 %v540_v0 }
  0x54   :  { %428 = vmatpush3.bf16.msra.mxu1 %v427_v49 }
  0x55   :  { %429 = vmatprep.subr.bf16.mxu1 %v540_v0 }
  0x56   :  { %407 = vmatpush3.bf16.msra.mxu0 %v406_v48 }
  0x58   :  { %431 = vmatpush3.bf16.msra.mxu1 %v430_v53 }
  0x59   :  { %347 = vmatmul.mubr.f32.vlgmr.msra.gmra.mrb[0].mxu0 %v72_v50 }
 0x12c   :  { %v162_v55 = vpop.f32.mrb[0].mxu0 }
 0x12d   :  { %v163_v56 = vadd.f32 %v278_v54, %v162_v55  ;;  %v348_v57 = vpop.f32.mrb[1].mxu0 }
 0x12f   :  { %v166_v58 = vmax.f32 %v163_v56, 0.0 }
 0x131   :  { %382 = vmatmul.mubr.f32.vlgmr.msra.gmra.mrb[0].mxu1 %v166_v58 }
 0x204   :  { %v256_v60 = vpop.f32.mrb[0].mxu1 }
 0x205   :  { %v257_v61 = vadd.f32 %v279_v59, %v256_v60  ;;  %v383_v62 = vpop.f32.mrb[1].mxu1 }
 0x207   :  { %260 = vst [vmem:[#allocation8] sm:$0xff] %v257_v61 }
 0x208   :  { %518 = shalt.err (!%p515_p0)
}
 0x209   :  { %s519_s17 = scalar_lea.hbm %s664_s6, 128 }
 0x20a   :  { %p520_p1 = scmp.ne.s32.totalorder %s664_s6, %s519_s17  ;;  %p523_p2 = scmp.lt.u32.totalorder %s519_s17, %s664_s6 }
 0x20c   :  { %p525_p3 = pnand %p523_p2, %p520_p1 }
 0x20e   :  { %528 = shalt.err (!%p525_p3)
}
 0x20f   :  { %270 = dma.vmem_to_hbm [thread:$0]  %s268_s14, 128, %s664_s6, [#allocation4]  }
 0x210   :  { %533 = dma.done.wait [#allocation4], 128  }
 0x211   :  { %534 = vsyncadd [#allocation4], 4294967168 }
 0x212   :  { %274 = vsyncpa [#allocation3], 1 }
 0x213   :  { %275 = vsyncpa [#allocation6], 1 }
 0x214   :  { %276 = vsyncpa [#allocation4], 1 }

</bundles_post_ra>
